<compile_context>
chip_gen: v6e
topology: v6e:2x2x1
jax: 0.10.0
libtpu: 0.0.40
codegen_flags: <defaults>
</compile_context>

<pallas_src>
import functools

import jax
import jax.numpy as jnp
from jax import lax
from jax.experimental import pallas as pl
from jax.experimental.pallas import tpu as pltpu

EPS = 1e-5
VMEM_LIMIT = 32 * 1024 * 1024       # explicit scoped-VMEM limit (portable to v7x's 64 MiB physical)
TILE_BYTES = 4 * 1024 * 1024        # target bytes per logical block (before double-buffering)


def _pick_tile(total, align, max_size):
    """Largest multiple of `align` that divides `total` and is <= max_size.
    Falls back to `total` (full extent, always a legal block dim)."""
    if total <= max_size:
        return total
    t = (max_size // align) * align
    while t >= align:
        if total % t == 0:
            return t
        t -= align
    return total


def _pick_row_tile(H, W, C):
    """Spatial rows per tile for the fused attention kernel:
    divides H, lane width (th*W) a multiple of 128 (lane-dense stores), unroll-capped,
    and within the per-block VMEM budget.  Falls back to full H (always legal)."""
    cap = min(64, max(1, TILE_BYTES // (4 * C * W)))
    best = None
    for th in range(1, H + 1):
        if H % th == 0 and th <= cap and (th * W) % 128 == 0:
            best = th
    return best if best is not None else H


# --------------------------------------------------------------------------- kernels
def _gate_kernel(g_ref, xp_ref, w1_ref, w2_ref, b12_ref, w3_ref, b3_ref, psi_ref):
    # phi = conv1(g), theta = conv2(x) as channel-major matmuls on a pixel tile
    phi = jnp.dot(w1_ref[...], g_ref[0], preferred_element_type=jnp.float32)      # (C, TP)
    theta = jnp.dot(w2_ref[...], xp_ref[0], preferred_element_type=jnp.float32)   # (C, TP)
    z = jnp.maximum(phi + theta + b12_ref[...], 0.0)                              # relu
    # conv3 (C -> 1): VPU multiply + sublane reduction instead of an N=1 MXU matmul
    p = jnp.sum(z * w3_ref[...], axis=0, keepdims=True) + b3_ref[...]             # (1, TP)
    psi_ref[0] = jax.nn.sigmoid(p)                                                # lane-dense store


def _fused_attn_kernel(psi_ref, ar_ref, act_ref, x_ref, ww_ref, bw_ref,
                       y_ref, sum_ref, sq_ref, up_ref, *, th, W):
    r = pl.program_id(1)

    @pl.when(r == 0)
    def _():
        # bilinear upsample of psi, computed once per batch into VMEM scratch
        up_ref[...] = jnp.dot(
            jnp.dot(ar_ref[...], psi_ref[0], preferred_element_type=jnp.float32),
            act_ref[...], preferred_element_type=jnp.float32)                     # (H, W), H == W
        sum_ref[...] = jnp.zeros_like(sum_ref)
        sq_ref[...] = jnp.zeros_like(sq_ref)

    # W is a 1x1 conv (channel mixing only), so it commutes with the spatial right-multiply:
    #   W(x @ psi_up) = (W x) @ psi_up.  Apply W first as one lane-dense MXU matmul.
    xw = jnp.dot(ww_ref[...], x_ref[0], preferred_element_type=jnp.float32)       # (C, th*W)
    up = up_ref[...]
    # per spatial row in this tile:  y[:, i, :] = xw[:, i, :] @ up   (static offsets -> unrolled)
    rows = [jnp.dot(xw[:, i * W:(i + 1) * W], up, preferred_element_type=jnp.float32)
            for i in range(th)]
    y = jnp.concatenate(rows, axis=1) + bw_ref[...]                               # (C, th*W)
    y_ref[0] = y                                                                  # lane-dense store
    # BatchNorm partial statistics, accumulated across the spatial-row-tile axis
    sum_ref[0] += jnp.sum(y, axis=1, keepdims=True)
    sq_ref[0] += jnp.sum(y * y, axis=1, keepdims=True)


def _affine_kernel(y_ref, scale_ref, shift_ref, out_ref):
    # BN affine (scale/shift already fold mean, var, gamma, beta) — pure VPU, lane-dense
    out_ref[0] = y_ref[0] * scale_ref[...] + shift_ref[...]


# ----------------------------------------------------------------------------- glue
def bilinear_matrix(out_size, in_size):
    # PyTorch F.interpolate(mode='bilinear', align_corners=False) source index math
    i = jnp.arange(out_size, dtype=jnp.float32)
    src = jnp.maximum((i + 0.5) * (in_size / out_size) - 0.5, 0.0)
    i0f = jnp.floor(src)
    frac = src - i0f
    i0 = jnp.minimum(i0f.astype(jnp.int32), in_size - 1)
    i1 = jnp.minimum(i0 + 1, in_size - 1)
    a = jnp.zeros((out_size, in_size), jnp.float32)
    rows = jnp.arange(out_size)
    a = a.at[rows, i0].add(1.0 - frac)
    a = a.at[rows, i1].add(frac)
    return a


def attention_block(g, x, params):
    B, C, H, W = x.shape
    h, w = H // 2, W // 2
    assert g.shape == (B, 2 * C, h, w)
    assert H == W  # torch.matmul(x, psi) requires square spatial maps
    hw, HW = h * w, H * W

    # Channel-major views are FREE reshapes of the contiguous NCHW buffers.
    g_cm = g.reshape(B, 2 * C, hw)
    x_cm = x.reshape(B, C, HW)
    # space-to-depth for the 2x2/s2 conv2; patch order (ci, kh, kw) matches OIHW weight flattening.
    # TODO(synk): this is the one remaining host-side relayout of x; could be folded into the gate
    # kernel with stride-2 loads to save one x-sized HBM round trip.
    xp_cm = x.reshape(B, C, h, 2, w, 2).transpose(0, 1, 3, 5, 2, 4).reshape(B, 4 * C, hw)

    # tile sizes sized to a conservative VMEM budget (portable to v7x's 64 MiB)
    tp1 = _pick_tile(hw, 128, max(128, (TILE_BYTES // ((6 * C + 1) * 4)) // 128 * 128))
    th = _pick_row_tile(H, W, C)                       # spatial rows per fused-kernel tile
    tp2 = _pick_tile(HW, 128, max(128, (TILE_BYTES // (8 * C)) // 128 * 128))

    # ---- stage 1: psi = sigmoid(conv3(relu(conv1(g) + conv2(x)))) on the (h, w) grid, lane-dense
    psi_cm = pl.pallas_call(
        _gate_kernel,
        out_shape=jax.ShapeDtypeStruct((B, 1, hw), jnp.float32),
        grid=(B, hw // tp1),
        in_specs=[
            pl.BlockSpec((1, 2 * C, tp1), lambda b, p: (b, 0, p)),
            pl.BlockSpec((1, 4 * C, tp1), lambda b, p: (b, 0, p)),
            pl.BlockSpec((C, 2 * C), lambda b, p: (0, 0)),
            pl.BlockSpec((C, 4 * C), lambda b, p: (0, 0)),
            pl.BlockSpec((C, 1), lambda b, p: (0, 0)),
            pl.BlockSpec((C, 1), lambda b, p: (0, 0)),
            pl.BlockSpec((1, 1), lambda b, p: (0, 0)),
        ],
        out_specs=pl.BlockSpec((1, 1, tp1), lambda b, p: (b, 0, p)),
        compiler_params=pltpu.CompilerParams(
            dimension_semantics=("parallel", "parallel"),
            vmem_limit_bytes=VMEM_LIMIT),
    )(g_cm, xp_cm, params["w1m"], params["w2m"], params["b12"],
      params["w3c"], params["b3m"])
    psi3 = psi_cm.reshape(B, h, w)                       # free reshape

    # ---- stage 2: fused y = W(x @ psi_up) + bW  (channel-major, lane-dense) + BN partial sums
    a_r = bilinear_matrix(H, h)                          # (H, h)
    a_ct = bilinear_matrix(W, w).T                       # (w, W)
    fused = functools.partial(_fused_attn_kernel, th=th, W=W)
    y_cm, ysum, ysq = pl.pallas_call(
        fused,
        out_shape=(jax.ShapeDtypeStruct((B, C, HW), jnp.float32),
                   jax.ShapeDtypeStruct((B, C, 1), jnp.float32),
                   jax.ShapeDtypeStruct((B, C, 1), jnp.float32)),
        grid=(B, H // th),
        in_specs=[
            pl.BlockSpec((1, h, w), lambda b, r: (b, 0, 0)),
            pl.BlockSpec((H, h), lambda b, r: (0, 0)),
            pl.BlockSpec((w, W), lambda b, r: (0, 0)),
            pl.BlockSpec((1, C, th * W), lambda b, r: (b, 0, r)),
            pl.BlockSpec((C, C), lambda b, r: (0, 0)),
            pl.BlockSpec((C, 1), lambda b, r: (0, 0)),
        ],
        out_specs=(pl.BlockSpec((1, C, th * W), lambda b, r: (b, 0, r)),
                   pl.BlockSpec((1, C, 1), lambda b, r: (b, 0, 0)),
                   pl.BlockSpec((1, C, 1), lambda b, r: (b, 0, 0))),
        scratch_shapes=[pltpu.VMEM((H, W), jnp.float32)],
        compiler_params=pltpu.CompilerParams(
            dimension_semantics=("parallel", "arbitrary"),
            vmem_limit_bytes=VMEM_LIMIT),
    )(psi3, a_r, a_ct, x_cm, params["wWm"], params["bWm"])

    # tiny host-side BN stat math (C-length vectors).  E[y^2]-mean^2 in f32; cancellation risk
    # is negligible here because BN normalizes y to O(1) scale.
    n = float(B * HW)
    mean = jnp.sum(ysum[:, :, 0], axis=0) / n
    var = jnp.maximum(jnp.sum(ysq[:, :, 0], axis=0) / n - mean * mean, 0.0)   # biased (training BN)
    inv = lax.rsqrt(var + EPS)
    scale = (params["gamma_v"] * inv).reshape(C, 1)
    shift = (params["beta_v"] - mean * params["gamma_v"] * inv).reshape(C, 1)

    # ---- stage 3: elementwise BN affine, tiled over pixels, channel-major output
    out_cm = pl.pallas_call(
        _affine_kernel,
        out_shape=jax.ShapeDtypeStruct((B, C, HW), jnp.float32),
        grid=(B, HW // tp2),
        in_specs=[
            pl.BlockSpec((1, C, tp2), lambda b, p: (b, 0, p)),
            pl.BlockSpec((C, 1), lambda b, p: (0, 0)),
            pl.BlockSpec((C, 1), lambda b, p: (0, 0)),
        ],
        out_specs=pl.BlockSpec((1, C, tp2), lambda b, p: (b, 0, p)),
        compiler_params=pltpu.CompilerParams(
            dimension_semantics=("parallel", "parallel"),
            vmem_limit_bytes=VMEM_LIMIT),
    )(y_cm, scale, shift)

    return out_cm.reshape(B, C, H, W)                    # free reshape


# ------------------------------------------------------------------- params & reference
def make_params(chs, key):
    C = chs
    ks = jax.random.split(key, 8)
    w1 = jax.random.normal(ks[0], (C, 2 * C), jnp.float32) * 0.25    # conv1 (out, in)
    b1 = jax.random.normal(ks[1], (C,), jnp.float32) * 0.1
    w2 = jax.random.normal(ks[2], (C, C, 2, 2), jnp.float32) * 0.25  # conv2 OIHW
    b2 = jax.random.normal(ks[3], (C,), jnp.float32) * 0.1
    w3 = jax.random.normal(ks[4], (1, C), jnp.float32) * 0.25        # conv3 (out, in)
    b3 = jax.random.normal(ks[5], (1,), jnp.float32) * 0.1
    wW = jax.random.normal(ks[6], (C, C), jnp.float32) * 0.25        # W (out, in)
    bW = jax.random.normal(ks[7], (C,), jnp.float32) * 0.1
    gamma = jnp.ones((C,), jnp.float32)     # BatchNorm2d default affine init
    beta = jnp.zeros((C,), jnp.float32)
    return dict(
        w1=w1, b1=b1, w2=w2, b2=b2, w3=w3, b3=b3, wW=wW, bW=bW,
        gamma_v=gamma, beta_v=beta,
        # kernel-ready channel-major forms
        w1m=w1,                                   # (C, 2C)
        w2m=w2.reshape(C, 4 * C),                 # (C, 4C), patch order (ci, kh, kw)
        b12=(b1 + b2).reshape(C, 1),
        w3c=w3.reshape(C, 1),
        b3m=b3.reshape(1, 1),
        wWm=wW,                                   # (C, C)
        bWm=bW.reshape(C, 1),
    )


def reference(g, x, p):
    # pure-JAX mirror of the PyTorch forward (HIGHEST precision for a tight f32 baseline)
    hp = lax.Precision.HIGHEST
    B, C, H, W = x.shape
    h, w = H // 2, W // 2
    phi = jnp.einsum('oi,bihw->bohw', p["w1"], g, precision=hp) + p["b1"][None, :, None, None]
    theta = lax.conv_general_dilated(
        x, p["w2"], window_strides=(2, 2), padding='VALID',
        dimension_numbers=('NCHW', 'OIHW', 'NCHW'), precision=hp) + p["b2"][None, :, None, None]
    z = jax.nn.relu(theta + phi)
    psi = jnp.einsum('oi,bihw->bohw', p["w3"], z, precision=hp) + p["b3"][None, :, None, None]
    psi = jax.nn.sigmoid(psi)                                        # (B, 1, h, w)
    a_r = bilinear_matrix(H, h)
    a_c = bilinear_matrix(W, w)
    up = jnp.einsum('Rh,bhw,Cw->bRC', a_r, psi[:, 0], a_c, precision=hp)   # (B, H, W)
    attn = jnp.einsum('bcik,bkj->bcij', x, up, precision=hp)               # matmul(x, psi)
    y = jnp.einsum('oc,bcij->boij', p["wW"], attn, precision=hp) + p["bW"][None, :, None, None]
    mean = jnp.mean(y, axis=(0, 2, 3), keepdims=True)
    var = jnp.var(y, axis=(0, 2, 3), keepdims=True)                  # biased (BN training mode)
    return ((y - mean) * lax.rsqrt(var + EPS)
            * p["gamma_v"][None, :, None, None] + p["beta_v"][None, :, None, None])


# ------------------------------------------------------------------------------ main
if __name__ == "__main__":
    chs, B, H, W = 4, 2, 16, 16
    key = jax.random.PRNGKey(0)
    kx, kg, kp = jax.random.split(key, 3)
    x = jax.random.normal(kx, (B, chs, H, W), jnp.float32)
    g = jax.random.normal(kg, (B, 2 * chs, H // 2, W // 2), jnp.float32)
    params = make_params(chs, kp)

    fwd = jax.jit(attention_block)
    out = fwd(g, x, params)
    out = jax.block_until_ready(out)

    ref = reference(g, x, params)
    err = float(jnp.max(jnp.abs(out - ref)))
    assert out.shape == (B, chs, H, W), out.shape
    assert err < 5e-3, f"max abs error vs reference: {err}"
    print("KERNEL_OK")
</pallas_src>

<mosaic_0001>
module attributes {stable_mosaic.version = 11 : i64} {
  func.func private @main(%arg0: i32) attributes {dimension_semantics = [#tpu.dimension_semantics<core_parallel>], iteration_bounds = array<i64: 2>, tpu.core_type = #tpu.core_type<sc_scalar_subcore>, window_params = []} {
    return
  }
}

module attributes {stable_mosaic.version = 11 : i64} {
  func.func private @main(%arg0: i32) attributes {dimension_semantics = [#tpu.dimension_semantics<core_parallel>], iteration_bounds = array<i64: 2>, tpu.core_type = #tpu.core_type<sc_scalar_subcore>, window_params = []} {
    return
  }
}

module attributes {stable_mosaic.version = 11 : i64} {
  func.func @_gate_kernel(%arg0: i32, %arg1: i32, %arg2: memref<1x8x64xf32, #tpu.memory_space<vmem>>, %arg3: memref<1x16x64xf32, #tpu.memory_space<vmem>>, %arg4: memref<4x8xf32, #tpu.memory_space<vmem>>, %arg5: memref<4x16xf32, #tpu.memory_space<vmem>>, %arg6: memref<4x1xf32, #tpu.memory_space<vmem>>, %arg7: memref<4x1xf32, #tpu.memory_space<vmem>>, %arg8: memref<1x1xf32, #tpu.memory_space<vmem>>, %arg9: memref<1x1x64xf32, #tpu.memory_space<vmem>>) attributes {dimension_semantics = [#tpu.dimension_semantics<parallel>, #tpu.dimension_semantics<parallel>], iteration_bounds = array<i64: 2, 1>, scalar_prefetch = 0 : i64, scratch_operands = 0 : i64, tpu.core_type = #tpu.core_type<tc>, window_params = [{transform_indices = @transform_0, window_bounds = array<i64: 1, 8, 64>}, {transform_indices = @transform_1, window_bounds = array<i64: 1, 16, 64>}, {pipeline_mode = #tpu.pipeline_mode<synchronous>, transform_indices = @transform_2, window_bounds = array<i64: 4, 8>}, {pipeline_mode = #tpu.pipeline_mode<synchronous>, transform_indices = @transform_3, window_bounds = array<i64: 4, 16>}, {pipeline_mode = #tpu.pipeline_mode<synchronous>, transform_indices = @transform_4, window_bounds = array<i64: 4, 1>}, {pipeline_mode = #tpu.pipeline_mode<synchronous>, transform_indices = @transform_5, window_bounds = array<i64: 4, 1>}, {pipeline_mode = #tpu.pipeline_mode<synchronous>, transform_indices = @transform_6, window_bounds = array<i64: 1, 1>}, {transform_indices = @transform_7, window_bounds = array<i64: 1, 1, 64>}]} {
    %c0 = arith.constant 0 : index
    %c0_0 = arith.constant 0 : index
    %0 = vector.load %arg4[%c0, %c0_0] : memref<4x8xf32, #tpu.memory_space<vmem>>, vector<4x8xf32>
    %c0_1 = arith.constant 0 : index
    %c0_2 = arith.constant 0 : index
    %c0_3 = arith.constant 0 : index
    %1 = vector.load %arg2[%c0_1, %c0_2, %c0_3] : memref<1x8x64xf32, #tpu.memory_space<vmem>>, vector<1x8x64xf32>
    %2 = vector.shape_cast %1 : vector<1x8x64xf32> to vector<8x64xf32>
    %cst = arith.constant dense<0.000000e+00> : vector<4x64xf32>
    %3 = tpu.matmul %0, %2, %cst {dimension_numbers = #tpu.dot_dimension_numbers<[1], [0], [0], [1], [0, 0, 1, 1], [], []>} : vector<4x8xf32>, vector<8x64xf32>, vector<4x64xf32> -> vector<4x64xf32>
    %c0_4 = arith.constant 0 : index
    %c0_5 = arith.constant 0 : index
    %4 = vector.load %arg5[%c0_4, %c0_5] : memref<4x16xf32, #tpu.memory_space<vmem>>, vector<4x16xf32>
    %c0_6 = arith.constant 0 : index
    %c0_7 = arith.constant 0 : index
    %c0_8 = arith.constant 0 : index
    %5 = vector.load %arg3[%c0_6, %c0_7, %c0_8] : memref<1x16x64xf32, #tpu.memory_space<vmem>>, vector<1x16x64xf32>
    %6 = vector.shape_cast %5 : vector<1x16x64xf32> to vector<16x64xf32>
    %cst_9 = arith.constant dense<0.000000e+00> : vector<4x64xf32>
    %7 = tpu.matmul %4, %6, %cst_9 {dimension_numbers = #tpu.dot_dimension_numbers<[1], [0], [0], [1], [0, 0, 1, 1], [], []>} : vector<4x16xf32>, vector<16x64xf32>, vector<4x64xf32> -> vector<4x64xf32>
    %8 = arith.addf %3, %7 : vector<4x64xf32>
    %c0_10 = arith.constant 0 : index
    %c0_11 = arith.constant 0 : index
    %9 = vector.load %arg6[%c0_10, %c0_11] : memref<4x1xf32, #tpu.memory_space<vmem>>, vector<4x1xf32>
    %10 = vector.broadcast %9 : vector<4x1xf32> to vector<4x64xf32>
    %11 = arith.addf %8, %10 : vector<4x64xf32>
    %cst_12 = arith.constant 0.000000e+00 : f32
    %12 = vector.broadcast %cst_12 : f32 to vector<4x64xf32>
    %13 = arith.maximumf %11, %12 : vector<4x64xf32>
    %c0_13 = arith.constant 0 : index
    %c0_14 = arith.constant 0 : index
    %14 = vector.load %arg7[%c0_13, %c0_14] : memref<4x1xf32, #tpu.memory_space<vmem>>, vector<4x1xf32>
    %15 = vector.broadcast %14 : vector<4x1xf32> to vector<4x64xf32>
    %16 = arith.mulf %13, %15 : vector<4x64xf32>
    %cst_15 = arith.constant dense<0.000000e+00> : vector<64xf32>
    %17 = vector.multi_reduction <add>, %16, %cst_15 [0] : vector<4x64xf32> to vector<64xf32>
    %18 = vector.shape_cast %17 : vector<64xf32> to vector<1x64xf32>
    %c0_16 = arith.constant 0 : index
    %c0_17 = arith.constant 0 : index
    %19 = vector.load %arg8[%c0_16, %c0_17] : memref<1x1xf32, #tpu.memory_space<vmem>>, vector<1x1xf32>
    %20 = vector.broadcast %19 : vector<1x1xf32> to vector<1x64xf32>
    %21 = arith.addf %18, %20 : vector<1x64xf32>
    %22 = arith.negf %21 : vector<1x64xf32>
    %23 = math.exp %22 : vector<1x64xf32>
    %cst_18 = arith.constant 1.000000e+00 : f32
    %24 = vector.broadcast %cst_18 : f32 to vector<1x64xf32>
    %25 = arith.addf %24, %23 : vector<1x64xf32>
    %26 = arith.divf %24, %25 : vector<1x64xf32>
    %c0_19 = arith.constant 0 : index
    %c0_20 = arith.constant 0 : index
    %c0_21 = arith.constant 0 : index
    %27 = vector.load %arg9[%c0_19, %c0_20, %c0_21] : memref<1x1x64xf32, #tpu.memory_space<vmem>>, vector<1x1x64xf32>
    %28 = vector.shape_cast %27 : vector<1x1x64xf32> to vector<1x64xf32>
    %29 = vector.shape_cast %26 : vector<1x64xf32> to vector<1x1x64xf32>
    tpu.vector_store %arg9[%c0_19, %c0_20, %c0_21], %29 {strides = array<i32>} : memref<1x1x64xf32, #tpu.memory_space<vmem>>, vector<1x1x64xf32>,
    return
  }
  func.func @transform_0(%arg0: i32, %arg1: i32) -> (i32, i32, i32) {
    %c0_i32 = arith.constant 0 : i32
    %c0_i32_0 = arith.constant 0 : i32
    return %arg0, %c0_i32, %arg1 : i32, i32, i32
  }
  func.func @transform_1(%arg0: i32, %arg1: i32) -> (i32, i32, i32) {
    %c0_i32 = arith.constant 0 : i32
    %c0_i32_0 = arith.constant 0 : i32
    return %arg0, %c0_i32, %arg1 : i32, i32, i32
  }
  func.func @transform_2(%arg0: i32, %arg1: i32) -> (i32, i32) {
    %c0_i32 = arith.constant 0 : i32
    %c0_i32_0 = arith.constant 0 : i32
    %c0_i32_1 = arith.constant 0 : i32
    return %c0_i32, %c0_i32_0 : i32, i32
  }
  func.func @transform_3(%arg0: i32, %arg1: i32) -> (i32, i32) {
    %c0_i32 = arith.constant 0 : i32
    %c0_i32_0 = arith.constant 0 : i32
    %c0_i32_1 = arith.constant 0 : i32
    return %c0_i32, %c0_i32_0 : i32, i32
  }
  func.func @transform_4(%arg0: i32, %arg1: i32) -> (i32, i32) {
    %c0_i32 = arith.constant 0 : i32
    %c0_i32_0 = arith.constant 0 : i32
    %c0_i32_1 = arith.constant 0 : i32
    return %c0_i32, %c0_i32_0 : i32, i32
  }
  func.func @transform_5(%arg0: i32, %arg1: i32) -> (i32, i32) {
    %c0_i32 = arith.constant 0 : i32
    %c0_i32_0 = arith.constant 0 : i32
    %c0_i32_1 = arith.constant 0 : i32
    return %c0_i32, %c0_i32_0 : i32, i32
  }
  func.func @transform_6(%arg0: i32, %arg1: i32) -> (i32, i32) {
    %c0_i32 = arith.constant 0 : i32
    %c0_i32_0 = arith.constant 0 : i32
    %c0_i32_1 = arith.constant 0 : i32
    return %c0_i32, %c0_i32_0 : i32, i32
  }
  func.func @transform_7(%arg0: i32, %arg1: i32) -> (i32, i32, i32) {
    %c0_i32 = arith.constant 0 : i32
    %c0_i32_0 = arith.constant 0 : i32
    return %arg0, %c0_i32, %arg1 : i32, i32, i32
  }
}

module attributes {stable_mosaic.version = 11 : i64} {
  func.func @_fused_attn_kernel(%arg0: i32, %arg1: i32, %arg2: memref<1x8x8xf32, #tpu.memory_space<vmem>>, %arg3: memref<16x8xf32, #tpu.memory_space<vmem>>, %arg4: memref<8x16xf32, #tpu.memory_space<vmem>>, %arg5: memref<1x4x256xf32, #tpu.memory_space<vmem>>, %arg6: memref<4x4xf32, #tpu.memory_space<vmem>>, %arg7: memref<4x1xf32, #tpu.memory_space<vmem>>, %arg8: memref<1x4x256xf32, #tpu.memory_space<vmem>>, %arg9: memref<1x4x1xf32, #tpu.memory_space<vmem>>, %arg10: memref<1x4x1xf32, #tpu.memory_space<vmem>>, %arg11: memref<16x16xf32, #tpu.memory_space<vmem>>) attributes {dimension_semantics = [#tpu.dimension_semantics<parallel>, #tpu.dimension_semantics<arbitrary>], iteration_bounds = array<i64: 2, 1>, scalar_prefetch = 0 : i64, scratch_operands = 1 : i64, tpu.core_type = #tpu.core_type<tc>, window_params = [{transform_indices = @transform_0, window_bounds = array<i64: 1, 8, 8>}, {pipeline_mode = #tpu.pipeline_mode<synchronous>, transform_indices = @transform_1, window_bounds = array<i64: 16, 8>}, {pipeline_mode = #tpu.pipeline_mode<synchronous>, transform_indices = @transform_2, window_bounds = array<i64: 8, 16>}, {transform_indices = @transform_3, window_bounds = array<i64: 1, 4, 256>}, {pipeline_mode = #tpu.pipeline_mode<synchronous>, transform_indices = @transform_4, window_bounds = array<i64: 4, 4>}, {pipeline_mode = #tpu.pipeline_mode<synchronous>, transform_indices = @transform_5, window_bounds = array<i64: 4, 1>}, {transform_indices = @transform_6, window_bounds = array<i64: 1, 4, 256>}, {transform_indices = @transform_7, window_bounds = array<i64: 1, 4, 1>}, {transform_indices = @transform_8, window_bounds = array<i64: 1, 4, 1>}]} {
    %c0_i32 = arith.constant 0 : i32
    %0 = arith.cmpi eq, %arg1, %c0_i32 : i32
    %1 = arith.extui %0 : i1 to i32
    %c0_i32_0 = arith.constant 0 : i32
    %2 = arith.cmpi ne, %1, %c0_i32_0 : i32
    scf.if %2 {
      %c0_42 = arith.constant 0 : index
      %c0_43 = arith.constant 0 : index
      %64 = vector.load %arg3[%c0_42, %c0_43] : memref<16x8xf32, #tpu.memory_space<vmem>>, vector<16x8xf32>
      %c0_44 = arith.constant 0 : index
      %c0_45 = arith.constant 0 : index
      %c0_46 = arith.constant 0 : index
      %65 = vector.load %arg2[%c0_44, %c0_45, %c0_46] : memref<1x8x8xf32, #tpu.memory_space<vmem>>, vector<1x8x8xf32>
      %66 = vector.shape_cast %65 : vector<1x8x8xf32> to vector<8x8xf32>
      %cst_47 = arith.constant dense<0.000000e+00> : vector<16x8xf32>
      %67 = tpu.matmul %64, %66, %cst_47 {dimension_numbers = #tpu.dot_dimension_numbers<[1], [0], [0], [1], [0, 0, 1, 1], [], []>} : vector<16x8xf32>, vector<8x8xf32>, vector<16x8xf32> -> vector<16x8xf32>
      %c0_48 = arith.constant 0 : index
      %c0_49 = arith.constant 0 : index
      %68 = vector.load %arg4[%c0_48, %c0_49] : memref<8x16xf32, #tpu.memory_space<vmem>>, vector<8x16xf32>
      %cst_50 = arith.constant dense<0.000000e+00> : vector<16x16xf32>
      %69 = tpu.matmul %67, %68, %cst_50 {dimension_numbers = #tpu.dot_dimension_numbers<[1], [0], [0], [1], [0, 0, 1, 1], [], []>} : vector<16x8xf32>, vector<8x16xf32>, vector<16x16xf32> -> vector<16x16xf32>
      %c0_51 = arith.constant 0 : index
      %c0_52 = arith.constant 0 : index
      %70 = vector.load %arg11[%c0_51, %c0_52] : memref<16x16xf32, #tpu.memory_space<vmem>>, vector<16x16xf32>
      tpu.vector_store %arg11[%c0_51, %c0_52], %69 {strides = array<i32>} : memref<16x16xf32, #tpu.memory_space<vmem>>, vector<16x16xf32>,
      %cst_53 = arith.constant 0.000000e+00 : f32
      %71 = vector.broadcast %cst_53 : f32 to vector<1x4x1xf32>
      %c0_54 = arith.constant 0 : index
      %c0_55 = arith.constant 0 : index
      %c0_56 = arith.constant 0 : index
      %72 = vector.load %arg9[%c0_54, %c0_55, %c0_56] : memref<1x4x1xf32, #tpu.memory_space<vmem>>, vector<1x4x1xf32>
      tpu.vector_store %arg9[%c0_54, %c0_55, %c0_56], %71 {strides = array<i32>} : memref<1x4x1xf32, #tpu.memory_space<vmem>>, vector<1x4x1xf32>,
      %cst_57 = arith.constant 0.000000e+00 : f32
      %73 = vector.broadcast %cst_57 : f32 to vector<1x4x1xf32>
      %c0_58 = arith.constant 0 : index
      %c0_59 = arith.constant 0 : index
      %c0_60 = arith.constant 0 : index
      %74 = vector.load %arg10[%c0_58, %c0_59, %c0_60] : memref<1x4x1xf32, #tpu.memory_space<vmem>>, vector<1x4x1xf32>
      tpu.vector_store %arg10[%c0_58, %c0_59, %c0_60], %73 {strides = array<i32>} : memref<1x4x1xf32, #tpu.memory_space<vmem>>, vector<1x4x1xf32>,
    } else {
    }
    %c0 = arith.constant 0 : index
    %c0_1 = arith.constant 0 : index
    %3 = vector.load %arg6[%c0, %c0_1] : memref<4x4xf32, #tpu.memory_space<vmem>>, vector<4x4xf32>
    %c0_2 = arith.constant 0 : index
    %c0_3 = arith.constant 0 : index
    %c0_4 = arith.constant 0 : index
    %4 = vector.load %arg5[%c0_2, %c0_3, %c0_4] : memref<1x4x256xf32, #tpu.memory_space<vmem>>, vector<1x4x256xf32>
    %5 = vector.shape_cast %4 : vector<1x4x256xf32> to vector<4x256xf32>
    %cst = arith.constant dense<0.000000e+00> : vector<4x256xf32>
    %6 = tpu.matmul %3, %5, %cst {dimension_numbers = #tpu.dot_dimension_numbers<[1], [0], [0], [1], [0, 0, 1, 1], [], []>} : vector<4x4xf32>, vector<4x256xf32>, vector<4x256xf32> -> vector<4x256xf32>
    %c0_5 = arith.constant 0 : index
    %c0_6 = arith.constant 0 : index
    %7 = vector.load %arg11[%c0_5, %c0_6] : memref<16x16xf32, #tpu.memory_space<vmem>>, vector<16x16xf32>
    %8 = vector.extract_strided_slice %6 {offsets = [0, 0], sizes = [4, 16], strides = [1, 1]} : vector<4x256xf32> to vector<4x16xf32>
    %cst_7 = arith.constant dense<0.000000e+00> : vector<4x16xf32>
    %9 = tpu.matmul %8, %7, %cst_7 {dimension_numbers = #tpu.dot_dimension_numbers<[1], [0], [0], [1], [0, 0, 1, 1], [], []>} : vector<4x16xf32>, vector<16x16xf32>, vector<4x16xf32> -> vector<4x16xf32>
    %10 = vector.extract_strided_slice %6 {offsets = [0, 16], sizes = [4, 16], strides = [1, 1]} : vector<4x256xf32> to vector<4x16xf32>
    %cst_8 = arith.constant dense<0.000000e+00> : vector<4x16xf32>
    %11 = tpu.matmul %10, %7, %cst_8 {dimension_numbers = #tpu.dot_dimension_numbers<[1], [0], [0], [1], [0, 0, 1, 1], [], []>} : vector<4x16xf32>, vector<16x16xf32>, vector<4x16xf32> -> vector<4x16xf32>
    %12 = vector.extract_strided_slice %6 {offsets = [0, 32], sizes = [4, 16], strides = [1, 1]} : vector<4x256xf32> to vector<4x16xf32>
    %cst_9 = arith.constant dense<0.000000e+00> : vector<4x16xf32>
    %13 = tpu.matmul %12, %7, %cst_9 {dimension_numbers = #tpu.dot_dimension_numbers<[1], [0], [0], [1], [0, 0, 1, 1], [], []>} : vector<4x16xf32>, vector<16x16xf32>, vector<4x16xf32> -> vector<4x16xf32>
    %14 = vector.extract_strided_slice %6 {offsets = [0, 48], sizes = [4, 16], strides = [1, 1]} : vector<4x256xf32> to vector<4x16xf32>
    %cst_10 = arith.constant dense<0.000000e+00> : vector<4x16xf32>
    %15 = tpu.matmul %14, %7, %cst_10 {dimension_numbers = #tpu.dot_dimension_numbers<[1], [0], [0], [1], [0, 0, 1, 1], [], []>} : vector<4x16xf32>, vector<16x16xf32>, vector<4x16xf32> -> vector<4x16xf32>
    %16 = vector.extract_strided_slice %6 {offsets = [0, 64], sizes = [4, 16], strides = [1, 1]} : vector<4x256xf32> to vector<4x16xf32>
    %cst_11 = arith.constant dense<0.000000e+00> : vector<4x16xf32>
    %17 = tpu.matmul %16, %7, %cst_11 {dimension_numbers = #tpu.dot_dimension_numbers<[1], [0], [0], [1], [0, 0, 1, 1], [], []>} : vector<4x16xf32>, vector<16x16xf32>, vector<4x16xf32> -> vector<4x16xf32>
    %18 = vector.extract_strided_slice %6 {offsets = [0, 80], sizes = [4, 16], strides = [1, 1]} : vector<4x256xf32> to vector<4x16xf32>
    %cst_12 = arith.constant dense<0.000000e+00> : vector<4x16xf32>
    %19 = tpu.matmul %18, %7, %cst_12 {dimension_numbers = #tpu.dot_dimension_numbers<[1], [0], [0], [1], [0, 0, 1, 1], [], []>} : vector<4x16xf32>, vector<16x16xf32>, vector<4x16xf32> -> vector<4x16xf32>
    %20 = vector.extract_strided_slice %6 {offsets = [0, 96], sizes = [4, 16], strides = [1, 1]} : vector<4x256xf32> to vector<4x16xf32>
    %cst_13 = arith.constant dense<0.000000e+00> : vector<4x16xf32>
    %21 = tpu.matmul %20, %7, %cst_13 {dimension_numbers = #tpu.dot_dimension_numbers<[1], [0], [0], [1], [0, 0, 1, 1], [], []>} : vector<4x16xf32>, vector<16x16xf32>, vector<4x16xf32> -> vector<4x16xf32>
    %22 = vector.extract_strided_slice %6 {offsets = [0, 112], sizes = [4, 16], strides = [1, 1]} : vector<4x256xf32> to vector<4x16xf32>
    %cst_14 = arith.constant dense<0.000000e+00> : vector<4x16xf32>
    %23 = tpu.matmul %22, %7, %cst_14 {dimension_numbers = #tpu.dot_dimension_numbers<[1], [0], [0], [1], [0, 0, 1, 1], [], []>} : vector<4x16xf32>, vector<16x16xf32>, vector<4x16xf32> -> vector<4x16xf32>
    %24 = vector.extract_strided_slice %6 {offsets = [0, 128], sizes = [4, 16], strides = [1, 1]} : vector<4x256xf32> to vector<4x16xf32>
    %cst_15 = arith.constant dense<0.000000e+00> : vector<4x16xf32>
    %25 = tpu.matmul %24, %7, %cst_15 {dimension_numbers = #tpu.dot_dimension_numbers<[1], [0], [0], [1], [0, 0, 1, 1], [], []>} : vector<4x16xf32>, vector<16x16xf32>, vector<4x16xf32> -> vector<4x16xf32>
    %26 = vector.extract_strided_slice %6 {offsets = [0, 144], sizes = [4, 16], strides = [1, 1]} : vector<4x256xf32> to vector<4x16xf32>
    %cst_16 = arith.constant dense<0.000000e+00> : vector<4x16xf32>
    %27 = tpu.matmul %26, %7, %cst_16 {dimension_numbers = #tpu.dot_dimension_numbers<[1], [0], [0], [1], [0, 0, 1, 1], [], []>} : vector<4x16xf32>, vector<16x16xf32>, vector<4x16xf32> -> vector<4x16xf32>
    %28 = vector.extract_strided_slice %6 {offsets = [0, 160], sizes = [4, 16], strides = [1, 1]} : vector<4x256xf32> to vector<4x16xf32>
    %cst_17 = arith.constant dense<0.000000e+00> : vector<4x16xf32>
    %29 = tpu.matmul %28, %7, %cst_17 {dimension_numbers = #tpu.dot_dimension_numbers<[1], [0], [0], [1], [0, 0, 1, 1], [], []>} : vector<4x16xf32>, vector<16x16xf32>, vector<4x16xf32> -> vector<4x16xf32>
    %30 = vector.extract_strided_slice %6 {offsets = [0, 176], sizes = [4, 16], strides = [1, 1]} : vector<4x256xf32> to vector<4x16xf32>
    %cst_18 = arith.constant dense<0.000000e+00> : vector<4x16xf32>
    %31 = tpu.matmul %30, %7, %cst_18 {dimension_numbers = #tpu.dot_dimension_numbers<[1], [0], [0], [1], [0, 0, 1, 1], [], []>} : vector<4x16xf32>, vector<16x16xf32>, vector<4x16xf32> -> vector<4x16xf32>
    %32 = vector.extract_strided_slice %6 {offsets = [0, 192], sizes = [4, 16], strides = [1, 1]} : vector<4x256xf32> to vector<4x16xf32>
    %cst_19 = arith.constant dense<0.000000e+00> : vector<4x16xf32>
    %33 = tpu.matmul %32, %7, %cst_19 {dimension_numbers = #tpu.dot_dimension_numbers<[1], [0], [0], [1], [0, 0, 1, 1], [], []>} : vector<4x16xf32>, vector<16x16xf32>, vector<4x16xf32> -> vector<4x16xf32>
    %34 = vector.extract_strided_slice %6 {offsets = [0, 208], sizes = [4, 16], strides = [1, 1]} : vector<4x256xf32> to vector<4x16xf32>
    %cst_20 = arith.constant dense<0.000000e+00> : vector<4x16xf32>
    %35 = tpu.matmul %34, %7, %cst_20 {dimension_numbers = #tpu.dot_dimension_numbers<[1], [0], [0], [1], [0, 0, 1, 1], [], []>} : vector<4x16xf32>, vector<16x16xf32>, vector<4x16xf32> -> vector<4x16xf32>
    %36 = vector.extract_strided_slice %6 {offsets = [0, 224], sizes = [4, 16], strides = [1, 1]} : vector<4x256xf32> to vector<4x16xf32>
    %cst_21 = arith.constant dense<0.000000e+00> : vector<4x16xf32>
    %37 = tpu.matmul %36, %7, %cst_21 {dimension_numbers = #tpu.dot_dimension_numbers<[1], [0], [0], [1], [0, 0, 1, 1], [], []>} : vector<4x16xf32>, vector<16x16xf32>, vector<4x16xf32> -> vector<4x16xf32>
    %38 = vector.extract_strided_slice %6 {offsets = [0, 240], sizes = [4, 16], strides = [1, 1]} : vector<4x256xf32> to vector<4x16xf32>
    %cst_22 = arith.constant dense<0.000000e+00> : vector<4x16xf32>
    %39 = tpu.matmul %38, %7, %cst_22 {dimension_numbers = #tpu.dot_dimension_numbers<[1], [0], [0], [1], [0, 0, 1, 1], [], []>} : vector<4x16xf32>, vector<16x16xf32>, vector<4x16xf32> -> vector<4x16xf32>
    %40 = tpu.concatenate %9, %11, %13, %15, %17, %19, %21, %23, %25, %27, %29, %31, %33, %35, %37, %39 in 1 : vector<4x16xf32>, vector<4x16xf32>, vector<4x16xf32>, vector<4x16xf32>, vector<4x16xf32>, vector<4x16xf32>, vector<4x16xf32>, vector<4x16xf32>, vector<4x16xf32>, vector<4x16xf32>, vector<4x16xf32>, vector<4x16xf32>, vector<4x16xf32>, vector<4x16xf32>, vector<4x16xf32>, vector<4x16xf32> -> vector<4x256xf32>
    %c0_23 = arith.constant 0 : index
    %c0_24 = arith.constant 0 : index
    %41 = vector.load %arg7[%c0_23, %c0_24] : memref<4x1xf32, #tpu.memory_space<vmem>>, vector<4x1xf32>
    %42 = vector.broadcast %41 : vector<4x1xf32> to vector<4x256xf32>
    %43 = arith.addf %40, %42 : vector<4x256xf32>
    %c0_25 = arith.constant 0 : index
    %c0_26 = arith.constant 0 : index
    %c0_27 = arith.constant 0 : index
    %44 = vector.load %arg8[%c0_25, %c0_26, %c0_27] : memref<1x4x256xf32, #tpu.memory_space<vmem>>, vector<1x4x256xf32>
    %45 = vector.shape_cast %44 : vector<1x4x256xf32> to vector<4x256xf32>
    %46 = vector.shape_cast %43 : vector<4x256xf32> to vector<1x4x256xf32>
    tpu.vector_store %arg8[%c0_25, %c0_26, %c0_27], %46 {strides = array<i32>} : memref<1x4x256xf32, #tpu.memory_space<vmem>>, vector<1x4x256xf32>,
    %c0_28 = arith.constant 0 : index
    %c0_29 = arith.constant 0 : index
    %c0_30 = arith.constant 0 : index
    %47 = vector.load %arg9[%c0_28, %c0_29, %c0_30] : memref<1x4x1xf32, #tpu.memory_space<vmem>>, vector<1x4x1xf32>
    %48 = vector.shape_cast %47 : vector<1x4x1xf32> to vector<4x1xf32>
    %cst_31 = arith.constant dense<0.000000e+00> : vector<4xf32>
    %49 = vector.multi_reduction <add>, %43, %cst_31 [1] : vector<4x256xf32> to vector<4xf32>
    %50 = vector.shape_cast %49 : vector<4xf32> to vector<4x1xf32>
    %51 = arith.addf %48, %50 : vector<4x1xf32>
    %c0_32 = arith.constant 0 : index
    %c0_33 = arith.constant 0 : index
    %c0_34 = arith.constant 0 : index
    %52 = vector.load %arg9[%c0_32, %c0_33, %c0_34] : memref<1x4x1xf32, #tpu.memory_space<vmem>>, vector<1x4x1xf32>
    %53 = vector.shape_cast %52 : vector<1x4x1xf32> to vector<4x1xf32>
    %54 = vector.shape_cast %51 : vector<4x1xf32> to vector<1x4x1xf32>
    tpu.vector_store %arg9[%c0_32, %c0_33, %c0_34], %54 {strides = array<i32>} : memref<1x4x1xf32, #tpu.memory_space<vmem>>, vector<1x4x1xf32>,
    %c0_35 = arith.constant 0 : index
    %c0_36 = arith.constant 0 : index
    %c0_37 = arith.constant 0 : index
    %55 = vector.load %arg10[%c0_35, %c0_36, %c0_37] : memref<1x4x1xf32, #tpu.memory_space<vmem>>, vector<1x4x1xf32>
    %56 = vector.shape_cast %55 : vector<1x4x1xf32> to vector<4x1xf32>
    %57 = arith.mulf %43, %43 : vector<4x256xf32>
    %cst_38 = arith.constant dense<0.000000e+00> : vector<4xf32>
    %58 = vector.multi_reduction <add>, %57, %cst_38 [1] : vector<4x256xf32> to vector<4xf32>
    %59 = vector.shape_cast %58 : vector<4xf32> to vector<4x1xf32>
    %60 = arith.addf %56, %59 : vector<4x1xf32>
    %c0_39 = arith.constant 0 : index
    %c0_40 = arith.constant 0 : index
    %c0_41 = arith.constant 0 : index
    %61 = vector.load %arg10[%c0_39, %c0_40, %c0_41] : memref<1x4x1xf32, #tpu.memory_space<vmem>>, vector<1x4x1xf32>
    %62 = vector.shape_cast %61 : vector<1x4x1xf32> to vector<4x1xf32>
    %63 = vector.shape_cast %60 : vector<4x1xf32> to vector<1x4x1xf32>
    tpu.vector_store %arg10[%c0_39, %c0_40, %c0_41], %63 {strides = array<i32>} : memref<1x4x1xf32, #tpu.memory_space<vmem>>, vector<1x4x1xf32>,
    return
  }
  func.func @transform_0(%arg0: i32, %arg1: i32) -> (i32, i32, i32) {
    %c0_i32 = arith.constant 0 : i32
    %c0_i32_0 = arith.constant 0 : i32
    %c0_i32_1 = arith.constant 0 : i32
    return %arg0, %c0_i32, %c0_i32_0 : i32, i32, i32
  }
  func.func @transform_1(%arg0: i32, %arg1: i32) -> (i32, i32) {
    %c0_i32 = arith.constant 0 : i32
    %c0_i32_0 = arith.constant 0 : i32
    %c0_i32_1 = arith.constant 0 : i32
    return %c0_i32, %c0_i32_0 : i32, i32
  }
  func.func @transform_2(%arg0: i32, %arg1: i32) -> (i32, i32) {
    %c0_i32 = arith.constant 0 : i32
    %c0_i32_0 = arith.constant 0 : i32
    %c0_i32_1 = arith.constant 0 : i32
    return %c0_i32, %c0_i32_0 : i32, i32
  }
  func.func @transform_3(%arg0: i32, %arg1: i32) -> (i32, i32, i32) {
    %c0_i32 = arith.constant 0 : i32
    %c0_i32_0 = arith.constant 0 : i32
    return %arg0, %c0_i32, %arg1 : i32, i32, i32
  }
  func.func @transform_4(%arg0: i32, %arg1: i32) -> (i32, i32) {
    %c0_i32 = arith.constant 0 : i32
    %c0_i32_0 = arith.constant 0 : i32
    %c0_i32_1 = arith.constant 0 : i32
    return %c0_i32, %c0_i32_0 : i32, i32
  }
  func.func @transform_5(%arg0: i32, %arg1: i32) -> (i32, i32) {
    %c0_i32 = arith.constant 0 : i32
    %c0_i32_0 = arith.constant 0 : i32
    %c0_i32_1 = arith.constant 0 : i32
    return %c0_i32, %c0_i32_0 : i32, i32
  }
  func.func @transform_6(%arg0: i32, %arg1: i32) -> (i32, i32, i32) {
    %c0_i32 = arith.constant 0 : i32
    %c0_i32_0 = arith.constant 0 : i32
    return %arg0, %c0_i32, %arg1 : i32, i32, i32
  }
  func.func @transform_7(%arg0: i32, %arg1: i32) -> (i32, i32, i32) {
    %c0_i32 = arith.constant 0 : i32
    %c0_i32_0 = arith.constant 0 : i32
    %c0_i32_1 = arith.constant 0 : i32
    return %arg0, %c0_i32, %c0_i32_0 : i32, i32, i32
  }
  func.func @transform_8(%arg0: i32, %arg1: i32) -> (i32, i32, i32) {
    %c0_i32 = arith.constant 0 : i32
    %c0_i32_0 = arith.constant 0 : i32
    %c0_i32_1 = arith.constant 0 : i32
    return %arg0, %c0_i32, %c0_i32_0 : i32, i32, i32
  }
}

module attributes {stable_mosaic.version = 11 : i64} {
  func.func @_affine_kernel(%arg0: i32, %arg1: i32, %arg2: memref<1x4x256xf32, #tpu.memory_space<vmem>>, %arg3: memref<4x1xf32, #tpu.memory_space<vmem>>, %arg4: memref<4x1xf32, #tpu.memory_space<vmem>>, %arg5: memref<1x4x256xf32, #tpu.memory_space<vmem>>) attributes {dimension_semantics = [#tpu.dimension_semantics<parallel>, #tpu.dimension_semantics<parallel>], iteration_bounds = array<i64: 2, 1>, scalar_prefetch = 0 : i64, scratch_operands = 0 : i64, tpu.core_type = #tpu.core_type<tc>, window_params = [{transform_indices = @transform_0, window_bounds = array<i64: 1, 4, 256>}, {pipeline_mode = #tpu.pipeline_mode<synchronous>, transform_indices = @transform_1, window_bounds = array<i64: 4, 1>}, {pipeline_mode = #tpu.pipeline_mode<synchronous>, transform_indices = @transform_2, window_bounds = array<i64: 4, 1>}, {transform_indices = @transform_3, window_bounds = array<i64: 1, 4, 256>}]} {
    %c0 = arith.constant 0 : index
    %c0_0 = arith.constant 0 : index
    %c0_1 = arith.constant 0 : index
    %0 = vector.load %arg2[%c0, %c0_0, %c0_1] : memref<1x4x256xf32, #tpu.memory_space<vmem>>, vector<1x4x256xf32>
    %1 = vector.shape_cast %0 : vector<1x4x256xf32> to vector<4x256xf32>
    %c0_2 = arith.constant 0 : index
    %c0_3 = arith.constant 0 : index
    %2 = vector.load %arg3[%c0_2, %c0_3] : memref<4x1xf32, #tpu.memory_space<vmem>>, vector<4x1xf32>
    %3 = vector.broadcast %2 : vector<4x1xf32> to vector<4x256xf32>
    %4 = arith.mulf %1, %3 : vector<4x256xf32>
    %c0_4 = arith.constant 0 : index
    %c0_5 = arith.constant 0 : index
    %5 = vector.load %arg4[%c0_4, %c0_5] : memref<4x1xf32, #tpu.memory_space<vmem>>, vector<4x1xf32>
    %6 = vector.broadcast %5 : vector<4x1xf32> to vector<4x256xf32>
    %7 = arith.addf %4, %6 : vector<4x256xf32>
    %c0_6 = arith.constant 0 : index
    %c0_7 = arith.constant 0 : index
    %c0_8 = arith.constant 0 : index
    %8 = vector.load %arg5[%c0_6, %c0_7, %c0_8] : memref<1x4x256xf32, #tpu.memory_space<vmem>>, vector<1x4x256xf32>
    %9 = vector.shape_cast %8 : vector<1x4x256xf32> to vector<4x256xf32>
    %10 = vector.shape_cast %7 : vector<4x256xf32> to vector<1x4x256xf32>
    tpu.vector_store %arg5[%c0_6, %c0_7, %c0_8], %10 {strides = array<i32>} : memref<1x4x256xf32, #tpu.memory_space<vmem>>, vector<1x4x256xf32>,
    return
  }
  func.func @transform_0(%arg0: i32, %arg1: i32) -> (i32, i32, i32) {
    %c0_i32 = arith.constant 0 : i32
    %c0_i32_0 = arith.constant 0 : i32
    return %arg0, %c0_i32, %arg1 : i32, i32, i32
  }
  func.func @transform_1(%arg0: i32, %arg1: i32) -> (i32, i32) {
    %c0_i32 = arith.constant 0 : i32
    %c0_i32_0 = arith.constant 0 : i32
    %c0_i32_1 = arith.constant 0 : i32
    return %c0_i32, %c0_i32_0 : i32, i32
  }
  func.func @transform_2(%arg0: i32, %arg1: i32) -> (i32, i32) {
    %c0_i32 = arith.constant 0 : i32
    %c0_i32_0 = arith.constant 0 : i32
    %c0_i32_1 = arith.constant 0 : i32
    return %c0_i32, %c0_i32_0 : i32, i32
  }
  func.func @transform_3(%arg0: i32, %arg1: i32) -> (i32, i32, i32) {
    %c0_i32 = arith.constant 0 : i32
    %c0_i32_0 = arith.constant 0 : i32
    return %arg0, %c0_i32, %arg1 : i32, i32, i32
  }
}

</mosaic_0001>

<bundles_post_ra>
// kernel: attention_block.3
= control target key start
LH: loop header
LB: loop body
LE: loop exit
PB: predicated region body
PF: predicated region fallthrough
CT: control target
= control target key end

     0   :  { %s751_s26 = smov 0   ;;  %s753_s27 = smov 0   ;;  %s804_s0 = inlined_call_operand.vmem [shape: f32[2,8,64], index: 0, kind: input, shape index: {}]   ;;  %s805_s1 = inlined_call_operand.vmem [shape: f32[2,16,64], index: 1, kind: input, shape index: {}]   ;;  %s806_s2 = inlined_call_operand.vmem [shape: f32[4,8], index: 2, kind: input, shape index: {}]   ;;  %s807_s3 = inlined_call_operand.vmem [shape: f32[4,16], index: 3, kind: input, shape index: {}]   ;;  %s808_s4 = inlined_call_operand.vmem [shape: f32[4,1], index: 4, kind: input, shape index: {}]   ;;  %s809_s5 = inlined_call_operand.vmem [shape: f32[4,1], index: 5, kind: input, shape index: {}]   ;;  %s810_s6 = inlined_call_operand.<no memory space> [shape: f32[1,1], index: 6, kind: input, shape index: {}]   ;;  %s811_s7 = inlined_call_operand.vmem [shape: f32[2,1,64], index: 7, kind: output, shape index: {}]  }
   0x1   :  { %v12_v0 = vstv %s810_s6  ;;  %s755_s28 = smov 0  }
   0x2   :  { %13 = vst [vmem:[#allocation2] sm:$0x1] %v12_v0 }
   0x3 LB: > { %s31_s6 = sadd.s32 1, %s699_s27  ;;  %p621_p0 = scmp.ge.s32.totalorder %s703_s28, 1  ;;  %s703_s28 = sphi %s755_s28, %s19_s28   ;;  %s699_s27 = sphi %s753_s27, %s813_s27   ;;  %s695_s26 = sphi %s751_s26, %s812_s26  }
   0x4   : > { %p33_p1 = scmp.ge.s32.totalorder %s31_s6, 2  ;;  %p272_p2 = scmp.lt.s32.totalorder %s703_s28, 3 }
   0x6   : > { %s815_s6 = smov (%p33_p1, %s31_s6), 0  ;;  %p273_p3 = pnand %p621_p0, %p272_p2 }
   0x7   : > { %p315_p4 = scmp.lt.s32.totalorder (!%p273_p3), %s695_s26, 1 }
   0x8   : > { %276 = sbr.rel (%p273_p3) target bundleno = 270 (0x10e), region = 48 }
   0xd   : > { %v705_v1 = vmov 0.0   ;;  %v489_v2 = vld [vmem:[%s808_s4] sm:$0xf]  ;;  %s817_s26 = smov (!%p315_p4, %s695_s26), 1  ;;  %vm706_vm0 = vmmov 0   ;;  %v707_v4 = vmov 0   ;;  %v518_v20 = vlaneseq }
   0xe   : > { %636 = vmatprep.subr.mxu0 %v705_v1  ;;  %643 = vmatprep.subr.mxu1 %v705_v1  ;;  %v512_v3 = vld [vmem:[#allocation2] sm:$0x1]  ;;  %s630_s8 = sshll.u32 %s817_s26, 4  ;;  %s622_s12 = sshll.u32 %s817_s26, 3  ;;  %vm415_vm1 = vcmask 64512   ;;  %vm341_vm2 = vcmask 130048  }
   0xf   : > { %645 = vmatprep.mubr.msk.f32.mxu1 %vm706_vm0, %v705_v1  ;;  %640 = vmatprep.mubr.msk.f32.mxu0 %vm706_vm0, %v705_v1  ;;  %s329_s11 = scalar_lea.vmem %s805_s1, %s630_s8  ;;  %s321_s15 = scalar_lea.vmem %s804_s0, %s622_s12  ;;  %v336_v6 = vld [vmem:[%s806_s2] sm:$0xf]  ;;  %vm504_vm3 = vcmask 519168   ;;  %v519_v24 = vshrl.u32 %v518_v20, 7  ;;  %vm529_vm4 = vcmask 516096  }
  0x10   : > { %675 = vset.pattern.permute.xlu0 %v707_v4  ;;  %676 = vset.pattern.permute.xlu1 %v707_v4  ;;  %v340_v5 = vld [vmem:[%s329_s11 + $0x8] sm:$0xff]  ;;  %v339_v7 = vld [vmem:[%s329_s11] sm:$0xff]  ;;  %s335_s24 = scalar_lea.vmem %s811_s7, %s817_s26 }
  0x11   : > { %492 = vperm.xlu0 %675, %v489_v2   ;;  %515 = vperm.xlu1 %676, %v512_v3   ;;  %v337_v8 = vld [vmem:[%s321_s15] sm:$0xff]  ;;  %v520_v27 = vsub.s32 0, %v519_v24 }
  0x12   : > { %637 = vmatpush3.msra.mxu0 %v340_v5  ;;  %v338_v9 = vld [vmem:[%s807_s3] sm:$0xf]  ;;  %644 = vmatpush3.msra.mxu1 %v337_v8 }
  0x13   : > { %v497_v10 = vld [vmem:[%s809_s5] sm:$0xf]  ;;  %638 = vmatprep.subr.mxu0 %v705_v1  ;;  %646 = vmatmul.mubr.msk.f32.vlgmr.msra.gmra.mxu1 %vm415_vm1, %v336_v6 }
  0x14   : > { %639 = vmatpush3.msra.mxu0 %v339_v7 }
  0x15   : > { %641 = vmatmul.mubr.msk.f32.vlgmr.msra.gmra.mxu0 %vm341_vm2, %v338_v9  ;;  %500 = vperm.xlu0 %675, %v497_v10  }
  0x8c   : > { %v493_v12 = vpop.permute.xlu0 %492  ;;  %v516_v28 = vpop.permute.xlu1 %515 }
  0x8d   : > { %v521_v31 = vrot.slane %v516_v28, %v520_v27 }
  0x90   : > { %v501_v19 = vpop.permute.xlu0 %500 }
  0xd3   : > { %v485_v11 = vpop.f32.mrf.mxu1 }
  0xd5   : > { %v411_v13 = vpop.f32.mrf.mxu0  ;;  %v647_v15 = vpop.f32.mrf.mxu1 }
  0xd6   : > { %v486_v14 = vadd.f32 %v485_v11, %v411_v13 }
  0xd7   : > { %v642_v16 = vpop.f32.mrf.mxu0 }
  0xd8   : > { %v495_v17 = vadd.f32 %v493_v12, %v486_v14 }
  0xda   : > { %v496_v18 = vmax.f32 %v495_v17, 0.0 }
  0xdc   : > { %v503_v21 = vmul.f32 %v501_v19, %v496_v18 }
  0xde   : > { %v505_v22 = vsel %vm504_vm3, %v503_v21, 0.0 }
  0xdf   : > { %v506_v23 = vrot.slane %v505_v22, 4 }
  0xe1   : > { %v507_v25 = vadd.f32 %v506_v23, %v505_v22 }
  0xe3   : > { %v508_v26 = vrot.slane %v507_v25, 2 }
  0xe5   : > { %v509_v29 = vadd.f32 %v508_v26, %v507_v25 }
  0xe7   : > { %v510_v30 = vrot.slane %v509_v29, 1 }
  0xe9   : > { %v511_v32 = vadd.f32 %v510_v30, %v509_v29 }
  0xeb   : > { %v522_v33 = vadd.f32 %v521_v31, %v511_v32 }
  0xed   : > { %v627_v34 = vmul.f32 -1.442695, %v522_v33 }
  0xef   : > { %677 = vpow2.f32 %v627_v34 }
  0xfc   : > { %v678_v35 = vpop.eup %677 }
  0xfd   : > { %v526_v36 = vadd.f32 1.0, %v678_v35 }
  0xff   : > { %679 = vrcp.f32 %v526_v36 }
 0x10c   : > { %v680_v37 = vpop.eup %679 }
 0x10d   : > { %530 = vst.msk [vmem:[%s335_s24] sm:$0x1] %vm529_vm4, %v680_v37 }
 0x10e PF: > { %s19_s28 = sadd.s32 1, %s703_s28   ;;  %s812_s26 = smov %s699_s27 }
 0x10f   : > { %p16_p5 = scmp.ge.s32.totalorder %s19_s28, 4   ;;  %s813_s27 = smov %s815_s6 }
 0x111   :  { %18 = sbr.rel (!%p16_p5) target bundleno = 3 (0x3), region = 81 }

// kernel: attention_block.5
= control target key start
LH: loop header
LB: loop body
LE: loop exit
PB: predicated region body
PF: predicated region fallthrough
CT: control target
= control target key end

     0   :  { %s413_s12 = smov 0   ;;  %s415_s13 = smov 0   ;;  %s452_s0 = inlined_call_operand.vmem [shape: f32[2,4,256], index: 0, kind: input, shape index: {}]   ;;  %s453_s1 = inlined_call_operand.vmem [shape: f32[4,1], index: 1, kind: input, shape index: {}]   ;;  %s454_s2 = inlined_call_operand.vmem [shape: f32[4,1], index: 2, kind: input, shape index: {}]   ;;  %s455_s3 = inlined_call_operand.vmem [shape: f32[2,4,256], index: 3, kind: output, shape index: {}]  }
   0x1   :  { %s417_s14 = smov 0  }
   0x2 LB: > { %s25_s15 = sadd.s32 1, %s385_s13  ;;  %p331_p0 = scmp.ge.s32.totalorder %s389_s14, 1  ;;  %s389_s14 = sphi %s417_s14, %s13_s14   ;;  %s385_s13 = sphi %s415_s13, %s457_s13   ;;  %s381_s12 = sphi %s413_s12, %s456_s12  }
   0x3   : > { %p27_p1 = scmp.ge.s32.totalorder %s25_s15, 2  ;;  %p158_p2 = scmp.lt.s32.totalorder %s389_s14, 3 }
   0x5   : > { %s459_s15 = smov (%p27_p1, %s25_s15), 0  ;;  %p159_p3 = pnand %p331_p0, %p158_p2 }
   0x6   : > { %p191_p4 = scmp.lt.s32.totalorder (!%p159_p3), %s381_s12, 1 }
   0x7   : > { %162 = sbr.rel (%p159_p3) target bundleno = 147 (0x93), region = 32 }
   0xc   : > { %v211_v0 = vld [vmem:[%s453_s1] sm:$0xf]  ;;  %v391_v1 = vmov 0   ;;  %v392_v3 = vmov 839922192   ;;  %v219_v5 = vlaneseq  ;;  %s461_s12 = smov (!%p191_p4, %s381_s12), 1 }
   0xd   : > { %366 = vset.pattern.permute.xlu0 %v391_v1  ;;  %v225_v2 = vld [vmem:[%s454_s2] sm:$0xf]  ;;  %v217_v4 = vunpack.c.l.s4 %v392_v3  ;;  %s338_s20 = sshll.u32 %s461_s12, 3 }
   0xe   : > { %214 = vperm.xlu0 %366, %v211_v0   ;;  %v220_v7 = vshrl.u32 %v219_v5, 7  ;;  %s198_s23 = scalar_lea.vmem %s452_s0, %s338_s20  ;;  %s208_s26 = scalar_lea.vmem %s455_s3, %s338_s20 }
   0xf   : > { %v218_v6 = vunpack.c.0.s8 %v217_v4  ;;  %v210_v11 = vld [vmem:[%s198_s23] sm:$0xff] }
  0x11   : > { %v221_v8 = vsub.s32 %v218_v6, %v220_v7 }
  0x12   : > { %228 = vperm.xlu0 %366, %v225_v2  }
  0x89   : > { %v215_v9 = vpop.permute.xlu0 %214 }
  0x8a   : > { %v222_v10 = vrot.slane %v215_v9, %v221_v8 }
  0x8c   : > { %v224_v13 = vmul.f32 %v222_v10, %v210_v11 }
  0x8d   : > { %v229_v12 = vpop.permute.xlu0 %228 }
  0x8e   : > { %v236_v14 = vrot.slane %v229_v12, %v221_v8 }
  0x90   : > { %v238_v15 = vadd.f32 %v236_v14, %v224_v13 }
  0x92   : > { %239 = vst [vmem:[%s208_s26] sm:$0xff] %v238_v15 }
  0x93 PF: > { %s13_s14 = sadd.s32 1, %s389_s14   ;;  %s456_s12 = smov %s385_s13 }
  0x94   : > { %p10_p5 = scmp.ge.s32.totalorder %s13_s14, 4   ;;  %s457_s13 = smov %s459_s15 }
  0x96   :  { %12 = sbr.rel (!%p10_p5) target bundleno = 2 (0x2), region = 62 }

// kernel: attention_block.4
= control target key start
LH: loop header
LB: loop body
LE: loop exit
PB: predicated region body
PF: predicated region fallthrough
CT: control target
= control target key end

     0   :  { %s2428_s27 = smov 0   ;;  %s2430_s28 = smov 0   ;;  %s2685_s0 = inlined_call_operand.vmem [shape: f32[2,8,8], index: 0, kind: input, shape index: {}]   ;;  %s2686_s1 = inlined_call_operand.vmem [shape: f32[16,8], index: 1, kind: input, shape index: {}]   ;;  %s2687_s2 = inlined_call_operand.vmem [shape: f32[8,16], index: 2, kind: input, shape index: {}]   ;;  %s2688_s3 = inlined_call_operand.vmem [shape: f32[2,4,256], index: 3, kind: input, shape index: {}]   ;;  %s2689_s4 = inlined_call_operand.vmem [shape: f32[4,4], index: 4, kind: input, shape index: {}]   ;;  %s2690_s5 = inlined_call_operand.vmem [shape: f32[4,1], index: 5, kind: input, shape index: {}]   ;;  %s2691_s6 = inlined_call_operand.vmem [shape: f32[2,4,256], index: 6, kind: output, shape index: {0}]   ;;  %s2692_s7 = inlined_call_operand.vmem [shape: f32[2,4,1], index: 7, kind: output, shape index: {1}]   ;;  %s2693_s8 = inlined_call_operand.vmem [shape: f32[2,4,1], index: 8, kind: output, shape index: {2}]  }
   0x1   :  { %s2432_s29 = smov 0  }
   0x2 LB: > { %s31_s30 = sadd.s32 1, %s2367_s28  ;;  %p2102_p0 = scmp.ge.s32.totalorder %s2371_s29, 1  ;;  %s2371_s29 = sphi %s2432_s29, %s19_s29   ;;  %s2367_s28 = sphi %s2430_s28, %s2695_s28   ;;  %s2363_s27 = sphi %s2428_s27, %s2694_s27  }
   0x3   : > { %p33_p1 = scmp.ge.s32.totalorder %s31_s30, 2  ;;  %p297_p2 = scmp.lt.s32.totalorder %s2371_s29, 3 }
   0x5   : > { %s2697_s30 = smov (%p33_p1, %s31_s30), 0  ;;  %p298_p3 = pnand %p2102_p0, %p297_p2 }
   0x6   : > { %p351_p4 = scmp.lt.s32.totalorder (!%p298_p3), %s2363_s27, 1  ;;  %s2374_s24 = smov (!%p298_p3), 80  }
   0x7   : > { %301 = sbr.rel (%p298_p3) target bundleno = 925 (0x39d), region = 44  ;;  %s2375_s25 = smov (!%p298_p3), 112  }
   0x8   : > { %s2376_s26 = smov (!%p298_p3), 64   ;;  %s2377_s9 = smov (!%p298_p3), 96  }
   0x9   : > { %s2378_s10 = smov (!%p298_p3), 32   ;;  %s2379_s12 = smov (!%p298_p3), 48  }
   0xa   : > { %s2380_s13 = smov (!%p298_p3), 16  }
   0xc   : > { %v387_v0 = vld [vmem:[%s2686_s1] sm:$0xff]  ;;  %vm390_vm0 = vcmask 64512   ;;  %s2699_s27 = smov (!%p351_p4, %s2363_s27), 1  ;;  %v388_v3 = vld [vmem:[%s2686_s1 + $0x8] sm:$0xff]  ;;  %vm568_vm1 = vcmask 1043456   ;;  %v2373_v5 = vmov 0.0  }
   0xd   : > { %2193 = vmatprep.mubr.msk.f32.mxu0 %vm390_vm0, %v387_v0  ;;  %s2453_s11 = sshll.u32 %s2699_s27, 3  ;;  %v560_v6 = vld [vmem:[%s2689_s4] sm:$0xf]  ;;  %vm564_vm2 = vcmask 31744   ;;  %vm2381_vm3 = vmmov 0   ;;  %v2382_v13 = vmov 0  }
   0xe   : > { %s354_s14 = scalar_lea.vmem %s2685_s0, %s2453_s11  ;;  %s363_s17 = scalar_lea.vmem %s2688_s3, %s2453_s11  ;;  %v472_v7 = vld [vmem:[%s2687_s2] sm:$0xff]  ;;  %2347 = vset.pattern.permute.xlu0 %v2382_v13  ;;  %vm554_vm4 = vcmask 130048   ;;  %vm557_vm5 = vcmask 3072   ;;  %vm1886_vm6 = vcmask 261120   ;;  %vm1888_vm7 = vcmask 392192  }
   0xf   : > { %v389_v1 = vld [vmem:[%s354_s14] sm:$0xff]  ;;  %2196 = vmatprep.subr.mxu1 %v472_v7  ;;  %s2108_s16 = sshll.u32 %s2699_s27, 2  ;;  %vm1890_vm8 = vcmask 523264   ;;  %vm1892_vm9 = vcmask 654336   ;;  %vm1894_vm10 = vcmask 785408   ;;  %vm1896_vm11 = vcmask 916480   ;;  %s373_s22 = scalar_lea.vmem %s2691_s6, %s2453_s11 }
  0x10   : > { %v561_v2 = vld [vmem:[%s363_s17] sm:$0xff]  ;;  %2191 = vmatprep.subr.mxu0 %v389_v1  ;;  %2197 = vmatpush3.msra.mxu1 %v472_v7  ;;  %s2644_s19 = scalar_lea.vmem %s2692_s7, %s2108_s16  ;;  %s382_s11 = scalar_lea.vmem %s2693_s8, %s2108_s16 }
  0x11   : > { %v563_v4 = vcombine.high %v561_v2, %v561_v2  ;;  %2192 = vmatpush3.msra.mxu0 %v389_v1  ;;  %2201 = vmatprep.subr.mxu1 %v2373_v5  ;;  %v1905_v12 = vld [vmem:[%s2690_s5] sm:$0xf]  ;;  %558 = vst.msk [vmem:[%s2644_s19] sm:$0xf] %vm557_vm5, %v2373_v5  ;;  %559 = vst.msk [vmem:[%s382_s11] sm:$0xf] %vm557_vm5, %v2373_v5 }
  0x12   : > { %2194 = vmatmul.mubr.msk.f32.vlgmr.msra.gmra.mxu0 %vm390_vm0, %v388_v3 }
  0x13   : > { %2114 = vmatprep.subr.msk.mxu0 %vm568_vm1, %v563_v4  ;;  %637 = vmatprep.mubr.f32.mxu0 %v2373_v5 }
  0x14   : > { %2115 = vmatpush1.msk.msra.mxu0 %vm568_vm1, %v561_v2 }
  0x15   : > { %2208 = vmatprep.subr.mxu0 %v2373_v5 }
  0x16   : > { %2116 = vmatmul.mubr.msk.f32.vlgmr.msra.gmra.mxu0 %vm564_vm2, %v560_v6 }
  0x17   : > { %2212 = vmatprep.mubr.msk.f32.mxu0 %vm2381_vm3, %v2373_v5 }
  0xd2   : > { %v2195_v8 = vpop.f32.mrf.mxu0 }
  0xd4   : > { %v463_v9 = vpop.f32.mrf.mxu0 }
  0xd5   : > { %2198 = vmatprep.mubr.msk.f32.mxu1 %vm390_vm0, %v463_v9 }
  0xd6   : > { %2199 = vmatmul.mubr.msk.f32.vlgmr.msra.gmra.mxu1 %vm390_vm0, %v2195_v8  ;;  %v639_v10 = vpop.f32.mrf.mxu0 }
  0xd7   : > { %868 = vrot.lane.b32.xlu1 %v639_v10, %s2374_s24  ;;  %720 = vrot.lane.b32.xlu0 %v639_v10, %s2375_s25 }
  0xd8   : > { %v2486_v11 = vpop.f32.mrf.mxu0  ;;  %2205 = vmatprep.mubr.msk.f32.mxu1 %vm2381_vm3, %v2373_v5 }
  0xdb   : > { %942 = vrot.lane.b32.xlu1 %v639_v10, %s2376_s26  ;;  %794 = vrot.lane.b32.xlu0 %v639_v10, %s2377_s9 }
  0xdf   : > { %1090 = vrot.lane.b32.xlu1 %v639_v10, %s2378_s10  ;;  %1016 = vrot.lane.b32.xlu0 %v639_v10, %s2379_s12 }
  0xe3   : > { %1164 = vrot.lane.b32.xlu0 %v639_v10, %s2380_s13  ;;  %1311 = vrot.lane.b32.xlu1 %v2486_v11, %s2375_s25 }
  0xe7   : > { %1385 = vrot.lane.b32.xlu0 %v2486_v11, %s2377_s9  ;;  %1459 = vrot.lane.b32.xlu1 %v2486_v11, %s2374_s24 }
  0xeb   : > { %1533 = vrot.lane.b32.xlu0 %v2486_v11, %s2376_s26  ;;  %1607 = vrot.lane.b32.xlu1 %v2486_v11, %s2379_s12 }
  0xef   : > { %1681 = vrot.lane.b32.xlu0 %v2486_v11, %s2378_s10  ;;  %1755 = vrot.lane.b32.xlu1 %v2486_v11, %s2380_s13 }
  0xf3   : > { %1908 = vperm.xlu0 %2347, %v1905_v12  }
 0x149   : > { %v721_v18 = vpop.permute.xlu0 %720  ;;  %v869_v19 = vpop.permute.xlu1 %868 }
 0x14d   : > { %v795_v20 = vpop.permute.xlu0 %794  ;;  %v943_v21 = vpop.permute.xlu1 %942 }
 0x151   : > { %v1017_v22 = vpop.permute.xlu0 %1016  ;;  %v1091_v23 = vpop.permute.xlu1 %1090 }
 0x155   : > { %v1165_v24 = vpop.permute.xlu0 %1164  ;;  %v1312_v25 = vpop.permute.xlu1 %1311 }
 0x159   : > { %v1386_v26 = vpop.permute.xlu0 %1385  ;;  %v1460_v27 = vpop.permute.xlu1 %1459 }
 0x15d   : > { %v1534_v28 = vpop.permute.xlu0 %1533  ;;  %v1608_v29 = vpop.permute.xlu1 %1607 }
 0x161   : > { %v1682_v30 = vpop.permute.xlu0 %1681  ;;  %v1756_v31 = vpop.permute.xlu1 %1755 }
 0x16e   : > { %v1909_v0 = vpop.permute.xlu0 %1908 }
 0x196   : > { %v2200_v14 = vpop.f32.mrf.mxu1 }
 0x197   : > { %556 = vst.msk [vmem:[#allocation2 + $0x8] sm:$0xff] %vm554_vm4, %v2200_v14 }
 0x198   : > { %v545_v15 = vpop.f32.mrf.mxu1 }
 0x199   : > { %555 = vst.msk [vmem:[#allocation2] sm:$0xff] %vm554_vm4, %v545_v15 }
 0x19e   : > { %v2512_v16 = vld [vmem:[#allocation2 + $0x8] sm:$0xff] }
 0x19f   : > { %2202 = vmatpush3.msra.mxu1 %v2512_v16  ;;  %2209 = vmatpush3.msra.mxu0 %v2512_v16 }
 0x1a0   : > { %v2516_v17 = vld [vmem:[#allocation2] sm:$0xff]  ;;  %2203 = vmatprep.subr.mxu1 %v2373_v5  ;;  %2210 = vmatprep.subr.mxu0 %v2373_v5 }
 0x1a1   : > { %2204 = vmatpush3.msra.mxu1 %v2516_v17  ;;  %2211 = vmatpush3.msra.mxu0 %v2516_v17 }
 0x1a2   : > { %2206 = vmatmul.mubr.msk.f32.vlgmr.msra.gmra.mxu1 %vm554_vm4, %v639_v10  ;;  %2213 = vmatmul.mubr.msk.f32.vlgmr.msra.gmra.mxu0 %vm554_vm4, %v721_v18 }
 0x1a3   : > { %2215 = vmatprep.subr.mxu1 %v2373_v5  ;;  %2222 = vmatprep.subr.mxu0 %v2373_v5 }
 0x1a4   : > { %2216 = vmatpush3.msra.mxu1 %v2512_v16  ;;  %2223 = vmatpush3.msra.mxu0 %v2512_v16 }
 0x1a5   : > { %2217 = vmatprep.subr.mxu1 %v2373_v5  ;;  %2224 = vmatprep.subr.mxu0 %v2373_v5 }
 0x1a6   : > { %2218 = vmatpush3.msra.mxu1 %v2516_v17  ;;  %2219 = vmatprep.mubr.msk.f32.mxu1 %vm2381_vm3, %v2373_v5 }
 0x1a7   : > { %2225 = vmatpush3.msra.mxu0 %v2516_v17  ;;  %2226 = vmatprep.mubr.msk.f32.mxu0 %vm2381_vm3, %v2373_v5 }
 0x1a8   : > { %2220 = vmatmul.mubr.msk.f32.vlgmr.msra.gmra.mxu1 %vm554_vm4, %v795_v20  ;;  %2227 = vmatmul.mubr.msk.f32.vlgmr.msra.gmra.mxu0 %vm554_vm4, %v869_v19 }
 0x1a9   : > { %2229 = vmatprep.subr.mxu1 %v2373_v5  ;;  %2236 = vmatprep.subr.mxu0 %v2373_v5 }
 0x1aa   : > { %2230 = vmatpush3.msra.mxu1 %v2512_v16  ;;  %2237 = vmatpush3.msra.mxu0 %v2512_v16 }
 0x1ab   : > { %2231 = vmatprep.subr.mxu1 %v2373_v5  ;;  %2238 = vmatprep.subr.mxu0 %v2373_v5 }
 0x1ac   : > { %2232 = vmatpush3.msra.mxu1 %v2516_v17  ;;  %2233 = vmatprep.mubr.msk.f32.mxu1 %vm2381_vm3, %v2373_v5 }
 0x1ad   : > { %2239 = vmatpush3.msra.mxu0 %v2516_v17  ;;  %2240 = vmatprep.mubr.msk.f32.mxu0 %vm2381_vm3, %v2373_v5 }
 0x1ae   : > { %2234 = vmatmul.mubr.msk.f32.vlgmr.msra.gmra.mxu1 %vm554_vm4, %v943_v21  ;;  %2241 = vmatmul.mubr.msk.f32.vlgmr.msra.gmra.mxu0 %vm554_vm4, %v1017_v22 }
 0x1af   : > { %2243 = vmatprep.subr.mxu1 %v2373_v5  ;;  %2250 = vmatprep.subr.mxu0 %v2373_v5 }
 0x1b0   : > { %2244 = vmatpush3.msra.mxu1 %v2512_v16  ;;  %2251 = vmatpush3.msra.mxu0 %v2512_v16 }
 0x1b1   : > { %2245 = vmatprep.subr.mxu1 %v2373_v5  ;;  %2252 = vmatprep.subr.mxu0 %v2373_v5 }
 0x1b2   : > { %2246 = vmatpush3.msra.mxu1 %v2516_v17  ;;  %2247 = vmatprep.mubr.msk.f32.mxu1 %vm2381_vm3, %v2373_v5 }
 0x1b3   : > { %2253 = vmatpush3.msra.mxu0 %v2516_v17  ;;  %2254 = vmatprep.mubr.msk.f32.mxu0 %vm2381_vm3, %v2373_v5 }
 0x1b4   : > { %2248 = vmatmul.mubr.msk.f32.vlgmr.msra.gmra.mxu1 %vm554_vm4, %v1091_v23  ;;  %2255 = vmatmul.mubr.msk.f32.vlgmr.msra.gmra.mxu0 %vm554_vm4, %v1165_v24 }
 0x1b5   : > { %2257 = vmatprep.subr.mxu1 %v2373_v5  ;;  %2264 = vmatprep.subr.mxu0 %v2373_v5 }
 0x1b6   : > { %2258 = vmatpush3.msra.mxu1 %v2512_v16  ;;  %2265 = vmatpush3.msra.mxu0 %v2512_v16 }
 0x1b7   : > { %2259 = vmatprep.subr.mxu1 %v2373_v5  ;;  %2266 = vmatprep.subr.mxu0 %v2373_v5 }
 0x1b8   : > { %2260 = vmatpush3.msra.mxu1 %v2516_v17  ;;  %2261 = vmatprep.mubr.msk.f32.mxu1 %vm2381_vm3, %v2373_v5 }
 0x1b9   : > { %2267 = vmatpush3.msra.mxu0 %v2516_v17  ;;  %2268 = vmatprep.mubr.msk.f32.mxu0 %vm2381_vm3, %v2373_v5 }
 0x1ba   : > { %2262 = vmatmul.mubr.msk.f32.vlgmr.msra.gmra.mxu1 %vm554_vm4, %v2486_v11  ;;  %2269 = vmatmul.mubr.msk.f32.vlgmr.msra.gmra.mxu0 %vm554_vm4, %v1312_v25 }
 0x1bb   : > { %2271 = vmatprep.subr.mxu1 %v2373_v5  ;;  %2278 = vmatprep.subr.mxu0 %v2373_v5 }
 0x1bc   : > { %2272 = vmatpush3.msra.mxu1 %v2512_v16  ;;  %2279 = vmatpush3.msra.mxu0 %v2512_v16 }
 0x1bd   : > { %2273 = vmatprep.subr.mxu1 %v2373_v5  ;;  %2280 = vmatprep.subr.mxu0 %v2373_v5 }
 0x1be   : > { %2274 = vmatpush3.msra.mxu1 %v2516_v17  ;;  %2275 = vmatprep.mubr.msk.f32.mxu1 %vm2381_vm3, %v2373_v5 }
 0x1bf   : > { %2281 = vmatpush3.msra.mxu0 %v2516_v17  ;;  %2282 = vmatprep.mubr.msk.f32.mxu0 %vm2381_vm3, %v2373_v5 }
 0x1c0   : > { %2276 = vmatmul.mubr.msk.f32.vlgmr.msra.gmra.mxu1 %vm554_vm4, %v1386_v26  ;;  %2283 = vmatmul.mubr.msk.f32.vlgmr.msra.gmra.mxu0 %vm554_vm4, %v1460_v27 }
 0x1c1   : > { %2285 = vmatprep.subr.mxu1 %v2373_v5  ;;  %2292 = vmatprep.subr.mxu0 %v2373_v5 }
 0x1c2   : > { %2286 = vmatpush3.msra.mxu1 %v2512_v16  ;;  %2293 = vmatpush3.msra.mxu0 %v2512_v16 }
 0x1c3   : > { %2287 = vmatprep.subr.mxu1 %v2373_v5  ;;  %2294 = vmatprep.subr.mxu0 %v2373_v5 }
 0x1c4   : > { %2288 = vmatpush3.msra.mxu1 %v2516_v17  ;;  %2289 = vmatprep.mubr.msk.f32.mxu1 %vm2381_vm3, %v2373_v5 }
 0x1c5   : > { %2295 = vmatpush3.msra.mxu0 %v2516_v17  ;;  %2296 = vmatprep.mubr.msk.f32.mxu0 %vm2381_vm3, %v2373_v5 }
 0x1c6   : > { %2290 = vmatmul.mubr.msk.f32.vlgmr.msra.gmra.mxu1 %vm554_vm4, %v1534_v28  ;;  %2297 = vmatmul.mubr.msk.f32.vlgmr.msra.gmra.mxu0 %vm554_vm4, %v1608_v29 }
 0x1c7   : > { %2299 = vmatprep.subr.mxu1 %v2373_v5  ;;  %2306 = vmatprep.subr.mxu0 %v2373_v5 }
 0x1c8   : > { %2300 = vmatpush3.msra.mxu1 %v2512_v16  ;;  %2307 = vmatpush3.msra.mxu0 %v2512_v16 }
 0x1c9   : > { %2301 = vmatprep.subr.mxu1 %v2373_v5  ;;  %2308 = vmatprep.subr.mxu0 %v2373_v5 }
 0x1ca   : > { %2302 = vmatpush3.msra.mxu1 %v2516_v17  ;;  %2303 = vmatprep.mubr.msk.f32.mxu1 %vm2381_vm3, %v2373_v5 }
 0x1cb   : > { %2309 = vmatpush3.msra.mxu0 %v2516_v17  ;;  %2310 = vmatprep.mubr.msk.f32.mxu0 %vm2381_vm3, %v2373_v5 }
 0x1cc   : > { %2304 = vmatmul.mubr.msk.f32.vlgmr.msra.gmra.mxu1 %vm554_vm4, %v1682_v30  ;;  %2311 = vmatmul.mubr.msk.f32.vlgmr.msra.gmra.mxu0 %vm554_vm4, %v1756_v31 }
 0x262   : > { %v2623_v32 = vpop.f32.mrf.mxu1  ;;  %v790_v33 = vpop.f32.mrf.mxu0 }
 0x263   : > { %1830 = vrot.lane.b32.xlu0 %v790_v33, %s2380_s13 }
 0x264   : > { %v2207_v34 = vpop.f32.mrf.mxu1  ;;  %v2214_v35 = vpop.f32.mrf.mxu0 }
 0x268   : > { %v864_v36 = vpop.f32.mrf.mxu1  ;;  %v938_v37 = vpop.f32.mrf.mxu0 }
 0x269   : > { %1834 = vrot.lane.b32.xlu0 %v864_v36, %s2378_s10 }
 0x26a   : > { %v2221_v38 = vpop.f32.mrf.mxu1  ;;  %v2228_v39 = vpop.f32.mrf.mxu0 }
 0x26d   : > { %1838 = vrot.lane.b32.xlu0 %v938_v37, %s2379_s12 }
 0x26e   : > { %v1012_v40 = vpop.f32.mrf.mxu1  ;;  %v1086_v41 = vpop.f32.mrf.mxu0 }
 0x26f   : > { %1842 = vrot.lane.b32.xlu1 %v1012_v40, %s2376_s26 }
 0x270   : > { %v2235_v42 = vpop.f32.mrf.mxu1  ;;  %v2242_v43 = vpop.f32.mrf.mxu0 }
 0x271   : > { %1846 = vrot.lane.b32.xlu0 %v1086_v41, %s2374_s24  ;;  %v1918_v41 = vld [vmem:[%s2644_s19] sm:$0xf] }
 0x272   : > { %v1927_v43 = vld [vmem:[%s382_s11] sm:$0xf] }
 0x274   : > { %v1160_v44 = vpop.f32.mrf.mxu1  ;;  %v1234_v45 = vpop.f32.mrf.mxu0 }
 0x275   : > { %1850 = vrot.lane.b32.xlu0 %v1160_v44, %s2377_s9 }
 0x276   : > { %v2249_v46 = vpop.f32.mrf.mxu1  ;;  %v2256_v47 = vpop.f32.mrf.mxu0 }
 0x279   : > { %1854 = vrot.lane.b32.xlu0 %v1234_v45, %s2375_s25 }
 0x27a   : > { %v1307_v48 = vpop.f32.mrf.mxu1  ;;  %v1381_v49 = vpop.f32.mrf.mxu0 }
 0x27b   : > { %1858 = vrot.lane.b32.xlu1 %v1381_v49, %s2380_s13 }
 0x27c   : > { %v2263_v50 = vpop.f32.mrf.mxu1  ;;  %v2270_v51 = vpop.f32.mrf.mxu0 }
 0x280   : > { %v1455_v52 = vpop.f32.mrf.mxu1  ;;  %v1529_v53 = vpop.f32.mrf.mxu0 }
 0x281   : > { %1862 = vrot.lane.b32.xlu1 %v1455_v52, %s2378_s10 }
 0x282   : > { %v2277_v54 = vpop.f32.mrf.mxu1  ;;  %v2284_v55 = vpop.f32.mrf.mxu0 }
 0x285   : > { %1866 = vrot.lane.b32.xlu1 %v1529_v53, %s2379_s12 }
 0x286   : > { %v1603_v56 = vpop.f32.mrf.mxu1  ;;  %v1677_v57 = vpop.f32.mrf.mxu0 }
 0x288   : > { %v2291_v58 = vpop.f32.mrf.mxu1  ;;  %v2298_v59 = vpop.f32.mrf.mxu0 }
 0x289   : > { %1870 = vrot.lane.b32.xlu1 %v1603_v56, %s2376_s26 }
 0x28c   : > { %v1751_v60 = vpop.f32.mrf.mxu1  ;;  %v1825_v61 = vpop.f32.mrf.mxu0 }
 0x28d   : > { %1874 = vrot.lane.b32.xlu1 %v1677_v57, %s2374_s24 }
 0x28e   : > { %v2305_v62 = vpop.f32.mrf.mxu1  ;;  %v2312_v63 = vpop.f32.mrf.mxu0 }
 0x291   : > { %1878 = vrot.lane.b32.xlu1 %v1751_v60, %s2377_s9 }
 0x295   : > { %1882 = vrot.lane.b32.xlu1 %v1825_v61, %s2375_s25 }
 0x2d5   : > { %v1831_v1 = vpop.permute.xlu0 %1830 }
 0x2d6   : > { %v1885_v11 = vsel %vm554_vm4, %v2623_v32, %v1831_v1 }
 0x2db   : > { %v1835_v2 = vpop.permute.xlu0 %1834 }
 0x2dc   : > { %v1887_v12 = vsel %vm1886_vm6, %v1885_v11, %v1835_v2 }
 0x2df   : > { %v1839_v4 = vpop.permute.xlu0 %1838 }
 0x2e0   : > { %v1889_v14 = vsel %vm1888_vm7, %v1887_v12, %v1839_v4 }
 0x2e1   : > { %v1843_v3 = vpop.permute.xlu1 %1842 }
 0x2e2   : > { %v1891_v15 = vsel %vm1890_vm8, %v1889_v14, %v1843_v3 }
 0x2e3   : > { %v1847_v7 = vpop.permute.xlu0 %1846 }
 0x2e4   : > { %v1893_v18 = vsel %vm1892_vm9, %v1891_v15, %v1847_v7 }
 0x2e7   : > { %v1851_v10 = vpop.permute.xlu0 %1850 }
 0x2e8   : > { %v1895_v19 = vsel %vm1894_vm10, %v1893_v18, %v1851_v10 }
 0x2eb   : > { %v1855_v16 = vpop.permute.xlu0 %1854 }
 0x2ec   : > { %v1897_v21 = vsel %vm1896_vm11, %v1895_v19, %v1855_v16 }
 0x2ed   : > { %v1859_v6 = vpop.permute.xlu1 %1858  ;;  %v1911_v25 = vadd.f32 %v1909_v0, %v1897_v21 }
 0x2ee   : > { %v1898_v20 = vsel %vm554_vm4, %v1307_v48, %v1859_v6 }
 0x2ef   : > { %v1928_v32 = vmul.f32 %v1911_v25, %v1911_v25  ;;  %v1919_v34 = vsel %vm568_vm1, %v1911_v25, 0.0 }
 0x2f1   : > { %v1930_v38 = vsel %vm568_vm1, %v1928_v32, 0.0 }
 0x2f3   : > { %v1863_v8 = vpop.permute.xlu1 %1862 }
 0x2f4   : > { %v1899_v22 = vsel %vm1886_vm6, %v1898_v20, %v1863_v8 }
 0x2f7   : > { %v1867_v9 = vpop.permute.xlu1 %1866 }
 0x2f8   : > { %v1900_v24 = vsel %vm1888_vm7, %v1899_v22, %v1867_v9 }
 0x2fb   : > { %v1871_v13 = vpop.permute.xlu1 %1870 }
 0x2fc   : > { %v1901_v26 = vsel %vm1890_vm8, %v1900_v24, %v1871_v13 }
 0x2ff   : > { %v1875_v17 = vpop.permute.xlu1 %1874 }
 0x300   : > { %v1902_v27 = vsel %vm1892_vm9, %v1901_v26, %v1875_v17 }
 0x303   : > { %v1879_v23 = vpop.permute.xlu1 %1878 }
 0x304   : > { %v1903_v28 = vsel %vm1894_vm10, %v1902_v27, %v1879_v23 }
 0x307   : > { %v1883_v29 = vpop.permute.xlu1 %1882 }
 0x308   : > { %v1904_v30 = vsel %vm1896_vm11, %v1903_v28, %v1883_v29 }
 0x309   : > { %v1912_v31 = vadd.f32 %v1909_v0, %v1904_v30 }
 0x30b   : > { %v1915_v33 = vcombine.low %v1911_v25, %v1912_v31  ;;  %v1920_v35 = vsel %vm568_vm1, %v1912_v31, 0.0  ;;  %v1929_v36 = vmul.f32 %v1912_v31, %v1912_v31 }
 0x30c   : > { %v1921_v37 = vadd.f32 %v1920_v35, %v1919_v34 }
 0x30d   : > { %1917 = vst [vmem:[%s373_s22] sm:$0xff] %v1915_v33  ;;  %v1931_v39 = vsel %vm568_vm1, %v1929_v36, 0.0 }
 0x30e   : > { %1922 = vadd.xlane.f32.xlu0 %v1921_v37  ;;  %v1932_v40 = vadd.f32 %v1931_v39, %v1930_v38 }
 0x310   : > { %1933 = vadd.xlane.f32.xlu1 %v1932_v40 }
 0x397   : > { %v1923_v42 = vpop.xlane.xlu0 %1922 }
 0x398   : > { %v1924_v44 = vadd.f32 %v1923_v42, %v1918_v41 }
 0x399   : > { %v1934_v45 = vpop.xlane.xlu1 %1933 }
 0x39a   : > { %1926 = vst.msk [vmem:[%s2644_s19] sm:$0xf] %vm557_vm5, %v1924_v44  ;;  %v1935_v46 = vadd.f32 %v1934_v45, %v1927_v43 }
 0x39c   : > { %1936 = vst.msk [vmem:[%s382_s11] sm:$0xf] %vm557_vm5, %v1935_v46 }
 0x39d PF: > { %s19_s29 = sadd.s32 1, %s2371_s29   ;;  %s2694_s27 = smov %s2367_s28 }
 0x39e   : > { %p16_p5 = scmp.ge.s32.totalorder %s19_s29, 4   ;;  %s2695_s28 = smov %s2697_s30 }
 0x3a0   :  { %18 = sbr.rel (!%p16_p5) target bundleno = 2 (0x2), region = 105 }

</bundles_post_ra>
